<compile_context>
chip_gen: v5e
topology: v5e:2x2
jax: 0.10.0
libtpu: 0.0.40
codegen_flags: <defaults>
</compile_context>

<pallas_src>
import math
import jax
import jax.numpy as jnp
from jax.experimental import pallas as pl
from jax.experimental.pallas import tpu as pltpu

# Problem sizes (module's __init__ fixes hidden=128; feature_num and
# classify_dim come from data in the original script, chosen small here).
FEATURE_NUM = 256
HIDDEN = 128
CLASSIFY_DIM = 10
BATCH = 256          # wrapper pads any batch up to a multiple of TILE_B
TILE_B = 128         # batch rows per grid step (multiple of 8 for f32)
LANE = 128           # lane-dense padding for the output / layer-2 N dim


def mlp_kernel(x_ref, w1_ref, b1_ref, w2_ref, b2_ref, o_ref):
    # layer1: Linear(feature_num, 128) + ReLU  (MXU matmul, f32 accumulate)
    # NOTE: on v6e/v7x, casting x/W1 to bf16 here (keeping the f32 accumulate)
    # would halve W1 traffic and ~double MXU throughput if accuracy allows;
    # kept f32 to match the PyTorch module's numerics exactly.
    h = jnp.dot(x_ref[...], w1_ref[...], preferred_element_type=jnp.float32)
    h = jnp.maximum(h + b1_ref[...], 0.0)          # bias + ReLU on VPU
    # layer2: Linear(128, classify_dim) — N already padded to 128 lanes
    y = jnp.dot(h, w2_ref[...], preferred_element_type=jnp.float32)
    o_ref[...] = (y + b2_ref[...]).astype(o_ref.dtype)


def net_fs_forward(x, w1, b1, w2, b2, *, tile_b=TILE_B):
    """x: (B, feature_num) float32. Returns logits (B, classify_dim)."""
    B, F = x.shape
    H = w1.shape[1]
    C = w2.shape[1]

    # Pad layer-2 N dim to a lane-dense multiple of 128 (zero columns -> the
    # extra output columns are exactly 0 and sliced off below).
    n_pad = max(LANE, pl.cdiv(C, LANE) * LANE)
    w2p = jnp.zeros((H, n_pad), w2.dtype).at[:, :C].set(w2)
    b2p = jnp.zeros((1, n_pad), b2.dtype).at[:, :C].set(b2)

    # Pad batch up to a multiple of the batch tile.
    bp = pl.cdiv(B, tile_b) * tile_b
    xp = x if bp == B else jnp.zeros((bp, F), x.dtype).at[:B, :].set(x)

    cost = pl.CostEstimate(
        flops=2 * bp * F * H + 2 * bp * H * n_pad,
        transcendentals=0,
        bytes_accessed=4 * (xp.size + w1.size + b1.size + w2p.size + b2p.size
                            + bp * n_pad),
    )

    out = pl.pallas_call(
        mlp_kernel,
        out_shape=jax.ShapeDtypeStruct((bp, n_pad), jnp.float32),
        grid_spec=pltpu.PrefetchScalarGridSpec(
            num_scalar_prefetch=0,
            grid=(bp // tile_b,),
            in_specs=[
                pl.BlockSpec((tile_b, F), lambda i: (i, 0)),   # x tile
                pl.BlockSpec((F, H),      lambda i: (0, 0)),   # W1 (resident)
                pl.BlockSpec((1, H),      lambda i: (0, 0)),   # b1 (resident)
                pl.BlockSpec((H, n_pad),  lambda i: (0, 0)),   # W2 (resident)
                pl.BlockSpec((1, n_pad),  lambda i: (0, 0)),   # b2 (resident)
            ],
            out_specs=pl.BlockSpec((tile_b, n_pad), lambda i: (i, 0)),
        ),
        compiler_params=pltpu.CompilerParams(
            dimension_semantics=("parallel",),   # batch axis -> 2 TCs on v7x
        ),
        cost_estimate=cost,
    )(xp, w1, b1, w2p, b2p)

    return out[:B, :C]


def init_params(key):
    """Deterministic init mimicking nn.Linear's default U(-1/sqrt(fan_in), +)."""
    k1, k2, k3, k4 = jax.random.split(key, 4)
    bound1 = 1.0 / math.sqrt(FEATURE_NUM)
    bound2 = 1.0 / math.sqrt(HIDDEN)
    w1 = jax.random.uniform(k1, (FEATURE_NUM, HIDDEN), jnp.float32, -bound1, bound1)
    b1 = jax.random.uniform(k2, (1, HIDDEN), jnp.float32, -bound1, bound1)
    w2 = jax.random.uniform(k3, (HIDDEN, CLASSIFY_DIM), jnp.float32, -bound2, bound2)
    b2 = jax.random.uniform(k4, (1, CLASSIFY_DIM), jnp.float32, -bound2, bound2)
    return w1, b1, w2, b2


if __name__ == "__main__":
    key = jax.random.PRNGKey(0)
    kx, kp = jax.random.split(key)
    # PyTorch forward does x.view(x.size(0), -1); we feed already-flat features.
    x = jax.random.normal(kx, (BATCH, FEATURE_NUM), jnp.float32)
    w1, b1, w2, b2 = init_params(kp)

    out = net_fs_forward(x, w1, b1, w2, b2)
    out = jax.block_until_ready(out)

    # Reference check in plain JAX (same math as the PyTorch module).
    ref = jnp.maximum(x @ w1 + b1, 0.0) @ w2 + b2
    assert out.shape == (BATCH, CLASSIFY_DIM)
    assert jnp.allclose(out, ref, atol=1e-5, rtol=1e-5)

    print("KERNEL_OK")
</pallas_src>

<mosaic_0001>
module attributes {stable_mosaic.version = 11 : i64} {
  func.func @mlp_kernel(%arg0: i32, %arg1: memref<128x256xf32, #tpu.memory_space<vmem>>, %arg2: memref<256x128xf32, #tpu.memory_space<vmem>>, %arg3: memref<1x128xf32, #tpu.memory_space<vmem>>, %arg4: memref<128x128xf32, #tpu.memory_space<vmem>>, %arg5: memref<1x128xf32, #tpu.memory_space<vmem>>, %arg6: memref<128x128xf32, #tpu.memory_space<vmem>>) attributes {dimension_semantics = [#tpu.dimension_semantics<parallel>], iteration_bounds = array<i64: 2>, scalar_prefetch = 0 : i64, scratch_operands = 0 : i64, tpu.core_type = #tpu.core_type<tc>, window_params = [{transform_indices = @transform_0, window_bounds = array<i64: 128, 256>}, {pipeline_mode = #tpu.pipeline_mode<synchronous>, transform_indices = @transform_1, window_bounds = array<i64: 256, 128>}, {pipeline_mode = #tpu.pipeline_mode<synchronous>, transform_indices = @transform_2, window_bounds = array<i64: 1, 128>}, {pipeline_mode = #tpu.pipeline_mode<synchronous>, transform_indices = @transform_3, window_bounds = array<i64: 128, 128>}, {pipeline_mode = #tpu.pipeline_mode<synchronous>, transform_indices = @transform_4, window_bounds = array<i64: 1, 128>}, {transform_indices = @transform_5, window_bounds = array<i64: 128, 128>}]} {
    %c0 = arith.constant 0 : index
    %c0_0 = arith.constant 0 : index
    %0 = vector.load %arg1[%c0, %c0_0] : memref<128x256xf32, #tpu.memory_space<vmem>>, vector<128x256xf32>
    %c0_1 = arith.constant 0 : index
    %c0_2 = arith.constant 0 : index
    %1 = vector.load %arg2[%c0_1, %c0_2] : memref<256x128xf32, #tpu.memory_space<vmem>>, vector<256x128xf32>
    %cst = arith.constant dense<0.000000e+00> : vector<128x128xf32>
    %2 = tpu.matmul %0, %1, %cst {dimension_numbers = #tpu.dot_dimension_numbers<[1], [0], [0], [1], [0, 0, 1, 1], [], []>} : vector<128x256xf32>, vector<256x128xf32>, vector<128x128xf32> -> vector<128x128xf32>
    %c0_3 = arith.constant 0 : index
    %c0_4 = arith.constant 0 : index
    %3 = vector.load %arg3[%c0_3, %c0_4] : memref<1x128xf32, #tpu.memory_space<vmem>>, vector<1x128xf32>
    %4 = vector.broadcast %3 : vector<1x128xf32> to vector<128x128xf32>
    %5 = arith.addf %2, %4 : vector<128x128xf32>
    %cst_5 = arith.constant 0.000000e+00 : f32
    %6 = vector.broadcast %cst_5 : f32 to vector<128x128xf32>
    %7 = arith.maximumf %5, %6 : vector<128x128xf32>
    %c0_6 = arith.constant 0 : index
    %c0_7 = arith.constant 0 : index
    %8 = vector.load %arg4[%c0_6, %c0_7] : memref<128x128xf32, #tpu.memory_space<vmem>>, vector<128x128xf32>
    %cst_8 = arith.constant dense<0.000000e+00> : vector<128x128xf32>
    %9 = tpu.matmul %7, %8, %cst_8 {dimension_numbers = #tpu.dot_dimension_numbers<[1], [0], [0], [1], [0, 0, 1, 1], [], []>} : vector<128x128xf32>, vector<128x128xf32>, vector<128x128xf32> -> vector<128x128xf32>
    %c0_9 = arith.constant 0 : index
    %c0_10 = arith.constant 0 : index
    %10 = vector.load %arg5[%c0_9, %c0_10] : memref<1x128xf32, #tpu.memory_space<vmem>>, vector<1x128xf32>
    %11 = vector.broadcast %10 : vector<1x128xf32> to vector<128x128xf32>
    %12 = arith.addf %9, %11 : vector<128x128xf32>
    %c0_11 = arith.constant 0 : index
    %c0_12 = arith.constant 0 : index
    %13 = vector.load %arg6[%c0_11, %c0_12] : memref<128x128xf32, #tpu.memory_space<vmem>>, vector<128x128xf32>
    tpu.vector_store %arg6[%c0_11, %c0_12], %12 {strides = array<i32>} : memref<128x128xf32, #tpu.memory_space<vmem>>, vector<128x128xf32>,
    return
  }
  func.func @transform_0(%arg0: i32) -> (i32, i32) {
    %c0_i32 = arith.constant 0 : i32
    %c0_i32_0 = arith.constant 0 : i32
    return %arg0, %c0_i32 : i32, i32
  }
  func.func @transform_1(%arg0: i32) -> (i32, i32) {
    %c0_i32 = arith.constant 0 : i32
    %c0_i32_0 = arith.constant 0 : i32
    %c0_i32_1 = arith.constant 0 : i32
    return %c0_i32, %c0_i32_0 : i32, i32
  }
  func.func @transform_2(%arg0: i32) -> (i32, i32) {
    %c0_i32 = arith.constant 0 : i32
    %c0_i32_0 = arith.constant 0 : i32
    %c0_i32_1 = arith.constant 0 : i32
    return %c0_i32, %c0_i32_0 : i32, i32
  }
  func.func @transform_3(%arg0: i32) -> (i32, i32) {
    %c0_i32 = arith.constant 0 : i32
    %c0_i32_0 = arith.constant 0 : i32
    %c0_i32_1 = arith.constant 0 : i32
    return %c0_i32, %c0_i32_0 : i32, i32
  }
  func.func @transform_4(%arg0: i32) -> (i32, i32) {
    %c0_i32 = arith.constant 0 : i32
    %c0_i32_0 = arith.constant 0 : i32
    %c0_i32_1 = arith.constant 0 : i32
    return %c0_i32, %c0_i32_0 : i32, i32
  }
  func.func @transform_5(%arg0: i32) -> (i32, i32) {
    %c0_i32 = arith.constant 0 : i32
    %c0_i32_0 = arith.constant 0 : i32
    return %arg0, %c0_i32 : i32, i32
  }
}

</mosaic_0001>

<bundles_post_ra>
// kernel: tpu_custom_call.1
= control target key start
LH: loop header
LB: loop body
LE: loop exit
PB: predicated region body
PF: predicated region fallthrough
CT: control target
= control target key end

     0   :  { %10 = vsyncpa [#allocation3], 0  ;;  %s1304_s0 = inlined_call_operand.hbm [shape: f32[256,256], index: 0, kind: input, shape index: {}]   ;;  %s1305_s1 = inlined_call_operand.hbm [shape: f32[256,128], index: 1, kind: input, shape index: {}]   ;;  %s1306_s2 = inlined_call_operand.vmem [shape: f32[1,128], index: 2, kind: input, shape index: {}]   ;;  %s1307_s3 = inlined_call_operand.hbm [shape: f32[128,128], index: 3, kind: input, shape index: {}]   ;;  %s1308_s4 = inlined_call_operand.vmem [shape: f32[1,128], index: 4, kind: input, shape index: {}]   ;;  %s1309_s5 = inlined_call_operand.hbm [shape: f32[256,128], index: 5, kind: output, shape index: {}]  }
   0x1   :  { %12 = vsyncpa [#allocation3 + $0x1], 0 }
   0x2   :  { %13 = vsyncpa [#allocation6], 0 }
   0x3   :  { %14 = vsyncpa [#allocation4], 0 }
   0x4   :  { %16 = vsyncpa [#allocation4 + $0x1], 0  ;;  %s1049_s18 = smov 0   ;;  %s1051_s19 = smov 0  }
   0x5   :  { %s1053_s20 = smov 0   ;;  %s1055_s21 = smov 0  }
   0x6 LB: > { %s1070_s22 = sadd.s32 4294967295, %s1009_s21   ;;  %s704_s23 = sadd.s32 4294967294, %s1009_s21   ;;  %s1009_s21 = sphi %s1055_s21, %s1319_s21   ;;  %s1005_s20 = sphi %s1053_s20, %s1318_s20   ;;  %s1001_s19 = sphi %s1051_s19, %s1317_s19   ;;  %s997_s18 = sphi %s1049_s18, %s1316_s18  }
   0x7   : > { %p42_p0 = scmp.ne.s32.totalorder %s1001_s19, %s997_s18  ;;  %p43_p1 = scmp.eq.s32.totalorder %s1070_s22, 0 }
   0x8   : > { %p150_p2 = scmp.eq.s32.totalorder %s1070_s22, 1  ;;  %p156_p3 = scmp.eq.s32.totalorder %s704_s23, 1 }
   0x9   : > { %p1079_p4 = por %p43_p1, %p42_p0  ;;  %p705_p5 = scmp.ge.s32.totalorder %s1009_s21, 1 }
   0xa   : > { %p1084_p6 = por %p156_p3, %p42_p0  ;;  %p163_p7 = scmp.lt.s32.totalorder %s1009_s21, 3 }
   0xb   : > { %s174_s28 = sshll.u32 %s1305_s1, 4  ;;  %s1011_s30 = smov [#allocation5]   ;;  %s175_s28 = int_to_ptr.hbm [resolvable:$true] %s174_s28 }
   0xc   : > { %p1092_p8 = pnand %p705_p5, %p163_p7  ;;  %s176_s6 = sshll.u32 %s1011_s30, 4  ;;  %s177_s6 = int_to_ptr.vmem [resolvable:$true] %s176_s6 }
   0xd   : > { %s191_s9 = sshll.u32 %s1307_s3, 4  ;;  %s1012_s10 = smov 128   ;;  %s192_s9 = int_to_ptr.hbm [resolvable:$true] %s191_s9 }
   0xe   : > { %p786_p9 = pneg %p1092_p8  ;;  %s1013_s11 = smov 8  }
   0xf   : > { %s1014_s12 = smov [#allocation7]   ;;  %s1105_s14 = sadd.s32 1, %s1009_s21  }
  0x10   : > { %p787_p10 = pnand %p786_p9, %p43_p1  ;;  %s193_s13 = sshll.u32 %s1014_s12, 4  ;;  %s194_s13 = int_to_ptr.vmem [resolvable:$true] %s193_s13 }
  0x11   : > { %s29_s15 = sadd.s32 1, %s1005_s20  ;;  %s26_s16 = ssub.s32 %s1009_s21, %s1105_s14 }
  0x12   : > { %789 = dma.hbm_to_vmem [thread:$0]  (!%p787_p10), %s175_s28, 4096, %s177_s6, [#allocation6], %s1012_s10, %s1012_s10, %s1013_s11  }
  0x13   : > { %792 = dma.hbm_to_vmem [thread:$0]  (!%p787_p10), %s192_s9, 2048, %s194_s13, [#allocation6], %s1012_s10, %s1012_s10, %s1013_s11  }
  0x14   : > { %p36_p12 = scmp.ne.s32.totalorder %s1005_s20, %s1001_s19  ;;  %p27_p13 = scmp.eq.s32.totalorder %s26_s16, 0 }
  0x15   : > { %p37_p0 = scmp.eq.s32.totalorder %s1009_s21, 0  ;;  %p803_p5 = scmp.lt.s32.totalorder %s1009_s21, 2 }
  0x16   : > { %p1115_p3 = por %p150_p2, %p36_p12  ;;  %s210_s26 = sand.u32 1, %s1005_s20  }
  0x17   : > { %s1121_s23 = scalar_select %p27_p13, %s1005_s20, %s29_s15  }
  0x18   : > { %p38_p7 = por %p37_p0, %p36_p12  ;;  %s709_s27 = sshll.u32 %s210_s26, 8 }
  0x19   : > { %s724_s28 = sshll.u32 %s1009_s21, 8  ;;  %s214_s8 = scalar_lea.vmem [#allocation2], %s709_s27 }
  0x1a   : > { %s220_s7 = scalar_lea.hbm %s1304_s0, %s724_s28  ;;  %s223_s9 = sshll.u32 %s214_s8, 4  ;;  %s224_s9 = int_to_ptr.vmem [resolvable:$true] %s223_s9 }
  0x1b   : > { %s221_s10 = sshll.u32 %s220_s7, 4  ;;  %p1128_p2 = pnand %p803_p5, %p38_p7  ;;  %s222_s10 = int_to_ptr.hbm [resolvable:$true] %s221_s10 }
  0x1c   : > { %s211_s12 = scalar_lea.sflag [#allocation3], %s210_s26  ;;  %s909_s13 = sshra.s32 %s222_s10, 4  ;;  %s910_s13 = int_to_ptr.hbm [resolvable:$true] %s909_s13 }
  0x1d   : > { %s911_s15 = scalar_lea.hbm %s910_s13, 256  ;;  %p913_p10 = pneg %p1128_p2 }
  0x1e   : > { %p912_p9 = scmp.ne.s32.totalorder %s910_s13, %s911_s15  ;;  %s916_s28 = scalar_lea.hbm %s1304_s0, 512 }
  0x1f   : > { %p917_p0 = scmp.lt.s32.totalorder %s910_s13, %s1304_s0  ;;  %p918_p5 = scmp.lt.s32.totalorder %s916_s28, %s911_s15 }
  0x20   : > { %p914_p12 = pnand %p913_p10, %p912_p9 }
  0x21   : > { %p919_p7 = por %p918_p5, %p917_p0 }
  0x22   : > { %p915_p13 = pneg %p914_p12 }
  0x24   : > { %p920_p11 = pnand %p919_p7, %p915_p13 }
  0x26   : > { %923 = shalt.err (!%p920_p11)
}
  0x27   : > { %s1015_s26 = smov 256   ;;  %s1016_s7 = smov 16  }
  0x28   : > { %796 = dma.hbm_to_vmem [thread:$0]  (!%p1128_p2), %s222_s10, 4096, %s224_s9, %s211_s12, %s1015_s26, %s1015_s26, %s1016_s7  }
  0x29   : > { %235 = sbr.rel (%p1092_p8) target bundleno = 439 (0x1b7), region = 40  ;;  %s1145_s8 = sand.u32 (!%p1092_p8), 1, %s1001_s19  }
  0x2a   : > { %s714_s16 = sshll.u32 (!%p1092_p8), %s1145_s8, 8  ;;  %s238_s13 = scalar_lea.sflag (!%p1092_p8), [#allocation3], %s1145_s8 }
  0x2b   : > { %s1149_s15 = scalar_lea.vmem (!%p1092_p8), [#allocation2], %s714_s16 }
  0x2e   : > { %984 = dma.done.wait (%p1079_p4), %s238_s13, 4096  }
  0x2f   : > { %986 = vsyncadd (%p1079_p4), %s238_s13, 4294963200 }
  0x30   : > { %988 = dma.done.wait (%p43_p1), [#allocation6], 6144  }
  0x31   : > { %990 = vsyncadd (%p43_p1), [#allocation6], 4294961152  ;;  %v328_v0 = vld [vmem:[#allocation5 + $0x78] sm:$0xff]  ;;  %v327_v1 = vld [vmem:[#allocation5 + $0x70] sm:$0xff]  ;;  %s717_s9 = sshll.u32 %s1145_s8, 7  ;;  %s725_s27 = sshll.u32 %s1070_s22, 7 }
  0x32   : > { %v1159_v2 = vld [vmem:[#allocation5 + $0xf8] sm:$0xff]  ;;  %349 = vmatpush.msra.mxu0 %v328_v0  ;;  %726 = vmatpush.msra.mxu3 %v328_v0  ;;  %v1161_v3 = vld [vmem:[#allocation5 + $0xf0] sm:$0xff]  ;;  %v326_v4 = vld [vmem:[#allocation5 + $0x68] sm:$0xff]  ;;  %s1252_s12 = scalar_lea.vmem [#allocation8], %s717_s9  ;;  %s608_s6 = scalar_lea.hbm %s1309_s5, %s725_s27 }
  0x33   : > { %414 = vmatpush.msra.mxu1 %v1159_v2  ;;  %v1164_v5 = vld [vmem:[#allocation5 + $0xe8] sm:$0xff]  ;;  %v325_v6 = vld [vmem:[#allocation5 + $0x60] sm:$0xff]  ;;  %v324_v8 = vld [vmem:[#allocation5 + $0x58] sm:$0xff]  ;;  %s609_s26 = sshll.u32 %s1252_s12, 4  ;;  %s611_s7 = sshll.u32 %s608_s6, 4  ;;  %s610_s26 = int_to_ptr.vmem [resolvable:$true] %s609_s26  ;;  %s612_s7 = int_to_ptr.hbm [resolvable:$true] %s611_s7 }
  0x34   : > { %350 = vmatpush.msra.mxu0 %v327_v1  ;;  %727 = vmatpush.msra.mxu3 %v327_v1  ;;  %v1167_v7 = vld [vmem:[#allocation5 + $0xe0] sm:$0xff]  ;;  %v1170_v9 = vld [vmem:[#allocation5 + $0xd8] sm:$0xff]  ;;  %v323_v10 = vld [vmem:[#allocation5 + $0x50] sm:$0xff]  ;;  %s597_s16 = scalar_lea.sflag [#allocation4], %s1145_s8  ;;  %s953_s13 = sshra.s32 %s612_s7, 4  ;;  %s954_s13 = int_to_ptr.hbm [resolvable:$true] %s953_s13 }
  0x35   : > { %415 = vmatpush.msra.mxu1 %v1161_v3  ;;  %v1173_v11 = vld [vmem:[#allocation5 + $0xd0] sm:$0xff]  ;;  %v322_v12 = vld [vmem:[#allocation5 + $0x48] sm:$0xff]  ;;  %v321_v14 = vld [vmem:[#allocation5 + $0x40] sm:$0xff]  ;;  %s959_s29 = scalar_lea.hbm %s1309_s5, 256  ;;  %p960_p11 = scmp.lt.s32.totalorder %s954_s13, %s1309_s5 }
  0x36   : > { %351 = vmatpush.msra.mxu0 %v326_v4  ;;  %728 = vmatpush.msra.mxu3 %v326_v4  ;;  %v1176_v13 = vld [vmem:[#allocation5 + $0xc8] sm:$0xff]  ;;  %v1179_v15 = vld [vmem:[#allocation5 + $0xc0] sm:$0xff]  ;;  %v320_v16 = vld [vmem:[#allocation5 + $0x38] sm:$0xff] }
  0x37   : > { %416 = vmatpush.msra.mxu1 %v1164_v5  ;;  %v1182_v17 = vld [vmem:[#allocation5 + $0xb8] sm:$0xff]  ;;  %v319_v18 = vld [vmem:[#allocation5 + $0x30] sm:$0xff]  ;;  %v318_v20 = vld [vmem:[#allocation5 + $0x28] sm:$0xff] }
  0x38   : > { %352 = vmatpush.msra.mxu0 %v325_v6  ;;  %729 = vmatpush.msra.mxu3 %v325_v6  ;;  %v335_v19 = vld [vmem:[#allocation5 + $0xb0] sm:$0xff]  ;;  %v334_v21 = vld [vmem:[#allocation5 + $0xa8] sm:$0xff]  ;;  %v317_v22 = vld [vmem:[#allocation5 + $0x20] sm:$0xff] }
  0x39   : > { %417 = vmatpush.msra.mxu1 %v1167_v7  ;;  %v333_v23 = vld [vmem:[#allocation5 + $0xa0] sm:$0xff]  ;;  %v316_v24 = vld [vmem:[#allocation5 + $0x18] sm:$0xff]  ;;  %v315_v26 = vld [vmem:[#allocation5 + $0x10] sm:$0xff] }
  0x3a   : > { %353 = vmatpush.msra.mxu0 %v324_v8  ;;  %730 = vmatpush.msra.mxu3 %v324_v8  ;;  %v332_v25 = vld [vmem:[#allocation5 + $0x98] sm:$0xff]  ;;  %v331_v27 = vld [vmem:[#allocation5 + $0x90] sm:$0xff]  ;;  %v314_v28 = vld [vmem:[#allocation5 + $0x8] sm:$0xff] }
  0x3b   : > { %418 = vmatpush.msra.mxu1 %v1170_v9  ;;  %v330_v29 = vld [vmem:[#allocation5 + $0x88] sm:$0xff]  ;;  %v313_v30 = vld [vmem:[#allocation5] sm:$0xff]  ;;  %v283_v35 = vld [vmem:[%s1149_s15 + $0x10] sm:$0xff] }
  0x3c   : > { %354 = vmatpush.msra.mxu0 %v323_v10  ;;  %731 = vmatpush.msra.mxu3 %v323_v10  ;;  %v281_v31 = vld [vmem:[%s1149_s15] sm:$0xff]  ;;  %v282_v34 = vld [vmem:[%s1149_s15 + $0x8] sm:$0xff]  ;;  %v307_v36 = vld [vmem:[%s1149_s15 + $0xd0] sm:$0xff] }
  0x3d   : > { %419 = vmatpush.msra.mxu1 %v1173_v11  ;;  %v305_v32 = vld [vmem:[%s1149_s15 + $0xc0] sm:$0xff]  ;;  %v284_v37 = vld [vmem:[%s1149_s15 + $0x18] sm:$0xff]  ;;  %v286_v40 = vld [vmem:[%s1149_s15 + $0x28] sm:$0xff] }
  0x3e   : > { %355 = vmatpush.msra.mxu0 %v322_v12  ;;  %732 = vmatpush.msra.mxu3 %v322_v12  ;;  %v329_v33 = vld [vmem:[#allocation5 + $0x80] sm:$0xff]  ;;  %v287_v41 = vld [vmem:[%s1149_s15 + $0x30] sm:$0xff]  ;;  %v288_v43 = vld [vmem:[%s1149_s15 + $0x38] sm:$0xff] }
  0x3f   : > { %420 = vmatpush.msra.mxu1 %v1176_v13  ;;  %v285_v38 = vld [vmem:[%s1149_s15 + $0x20] sm:$0xff]  ;;  %v311_v42 = vld [vmem:[%s1149_s15 + $0xf0] sm:$0xff]  ;;  %v306_v45 = vld [vmem:[%s1149_s15 + $0xc8] sm:$0xff] }
  0x40   : > { %356 = vmatpush.msra.mxu0 %v321_v14  ;;  %733 = vmatpush.msra.mxu3 %v321_v14  ;;  %v309_v39 = vld [vmem:[%s1149_s15 + $0xe0] sm:$0xff]  ;;  %v290_v46 = vld [vmem:[%s1149_s15 + $0x48] sm:$0xff]  ;;  %v291_v47 = vld [vmem:[%s1149_s15 + $0x50] sm:$0xff] }
  0x41   : > { %421 = vmatpush.msra.mxu1 %v1179_v15  ;;  %v289_v44 = vld [vmem:[%s1149_s15 + $0x40] sm:$0xff]  ;;  %v308_v48 = vld [vmem:[%s1149_s15 + $0xd8] sm:$0xff]  ;;  %v310_v51 = vld [vmem:[%s1149_s15 + $0xe8] sm:$0xff] }
  0x42   : > { %357 = vmatpush.msra.mxu0 %v320_v16  ;;  %734 = vmatpush.msra.mxu3 %v320_v16  ;;  %v292_v49 = vld [vmem:[%s1149_s15 + $0x58] sm:$0xff]  ;;  %v293_v50 = vld [vmem:[%s1149_s15 + $0x60] sm:$0xff]  ;;  %v294_v52 = vld [vmem:[%s1149_s15 + $0x68] sm:$0xff] }
  0x43   : > { %422 = vmatpush.msra.mxu1 %v1182_v17  ;;  %v295_v53 = vld [vmem:[%s1149_s15 + $0x70] sm:$0xff]  ;;  %v312_v54 = vld [vmem:[%s1149_s15 + $0xf8] sm:$0xff]  ;;  %v508_v58 = vld [vmem:[#allocation7 + $0x68] sm:$0xff] }
  0x44   : > { %358 = vmatpush.msra.mxu0 %v319_v18  ;;  %735 = vmatpush.msra.mxu3 %v319_v18  ;;  %v296_v55 = vld [vmem:[%s1149_s15 + $0x78] sm:$0xff]  ;;  %v509_v57 = vld [vmem:[#allocation7 + $0x70] sm:$0xff]  ;;  %v297_v59 = vld [vmem:[%s1149_s15 + $0x80] sm:$0xff] }
  0x45   : > { %423 = vmatpush.msra.mxu1 %v335_v19  ;;  %v510_v56 = vld [vmem:[#allocation7 + $0x78] sm:$0xff]  ;;  %v507_v60 = vld [vmem:[#allocation7 + $0x60] sm:$0xff]  ;;  %v298_v61 = vld [vmem:[%s1149_s15 + $0x88] sm:$0xff] }
  0x46   : > { %359 = vmatpush.msra.mxu0 %v318_v20  ;;  %736 = vmatpush.msra.mxu3 %v318_v20  ;;  %v506_v62 = vld [vmem:[#allocation7 + $0x58] sm:$0xff]  ;;  %v505_v63 = vld [vmem:[#allocation7 + $0x50] sm:$0xff]  ;;  %v504_v0 = vld [vmem:[#allocation7 + $0x48] sm:$0xff] }
  0x47   : > { %424 = vmatpush.msra.mxu1 %v334_v21  ;;  %515 = vmatpush.msra.mxu2 %v510_v56  ;;  %v299_v1 = vld [vmem:[%s1149_s15 + $0x90] sm:$0xff]  ;;  %v502_v4 = vld [vmem:[#allocation7 + $0x38] sm:$0xff]  ;;  %v500_v6 = vld [vmem:[#allocation7 + $0x28] sm:$0xff] }
  0x48   : > { %360 = vmatpush.msra.mxu0 %v317_v22  ;;  %737 = vmatpush.msra.mxu3 %v317_v22  ;;  %v499_v8 = vld [vmem:[#allocation7 + $0x20] sm:$0xff]  ;;  %v303_v10 = vld [vmem:[%s1149_s15 + $0xb0] sm:$0xff]  ;;  %v498_v12 = vld [vmem:[#allocation7 + $0x18] sm:$0xff] }
  0x49   : > { %425 = vmatpush.msra.mxu1 %v333_v23  ;;  %516 = vmatpush.msra.mxu2 %v509_v57  ;;  %v496_v14 = vld [vmem:[#allocation7 + $0x8] sm:$0xff]  ;;  %v1230_v16 = vld [vmem:[%s1306_s2] ss:$0 sm:$0xff] }
  0x4a   : > { %361 = vmatpush.msra.mxu0 %v316_v24  ;;  %738 = vmatpush.msra.mxu3 %v316_v24 }
  0x4b   : > { %426 = vmatpush.msra.mxu1 %v332_v25  ;;  %517 = vmatpush.msra.mxu2 %v508_v58 }
  0x4c   : > { %362 = vmatpush.msra.mxu0 %v315_v26  ;;  %739 = vmatpush.msra.mxu3 %v315_v26 }
  0x4d   : > { %427 = vmatpush.msra.mxu1 %v331_v27  ;;  %518 = vmatpush.msra.mxu2 %v507_v60 }
  0x4e   : > { %363 = vmatpush.msra.mxu0 %v314_v28  ;;  %740 = vmatpush.msra.mxu3 %v314_v28 }
  0x4f   : > { %428 = vmatpush.msra.mxu1 %v330_v29  ;;  %519 = vmatpush.msra.mxu2 %v506_v62 }
  0x50   : > { %364 = vmatpush.msra.mxu0 %v313_v30  ;;  %741 = vmatpush.msra.mxu3 %v313_v30 }
  0x51   : > { %365 = vmatmul.f32.vlgmr.msra.gmra.mxu0 %v281_v31  ;;  %401 = vmatmul.f32.vlgmr.msra.gmra.mxu3 %v305_v32 }
  0x52   : > { %742 = vmatpush.msrb.mxu3 %v1159_v2  ;;  %429 = vmatpush.msra.mxu1 %v329_v33  ;;  %v503_v2 = vld [vmem:[#allocation7 + $0x40] sm:$0xff] }
  0x53   : > { %430 = vmatmul.f32.vlgmr.msra.gmra.mxu1 %v282_v34  ;;  %520 = vmatpush.msra.mxu2 %v505_v63 }
  0x54   : > { %743 = vmatpush.msrb.mxu3 %v1161_v3  ;;  %v300_v3 = vld [vmem:[%s1149_s15 + $0x98] sm:$0xff] }
  0x55   : > { %521 = vmatpush.msra.mxu2 %v504_v0 }
  0x56   : > { %744 = vmatpush.msrb.mxu3 %v1164_v5  ;;  %v501_v5 = vld [vmem:[#allocation7 + $0x30] sm:$0xff] }
  0x57   : > { %522 = vmatpush.msra.mxu2 %v503_v2 }
  0x58   : > { %745 = vmatpush.msrb.mxu3 %v1167_v7  ;;  %v301_v7 = vld [vmem:[%s1149_s15 + $0xa0] sm:$0xff] }
  0x59   : > { %368 = vmatmul.f32.gmra.mxu0 %v283_v35  ;;  %404 = vmatmul.f32.gmra.mxu3 %v307_v36 }
  0x5a   : > { %746 = vmatpush.msrb.mxu3 %v1170_v9  ;;  %523 = vmatpush.msra.mxu2 %v502_v4  ;;  %v302_v9 = vld [vmem:[%s1149_s15 + $0xa8] sm:$0xff] }
  0x5b   : > { %433 = vmatmul.f32.gmra.mxu1 %v284_v37 }
  0x5c   : > { %747 = vmatpush.msrb.mxu3 %v1173_v11  ;;  %524 = vmatpush.msra.mxu2 %v501_v5  ;;  %v304_v11 = vld [vmem:[%s1149_s15 + $0xb8] sm:$0xff]  ;;  %s955_s15 = scalar_lea.hbm %s954_s13, 128 }
  0x5d   : > { %p956_p1 = scmp.ne.s32.totalorder %s954_s13, %s955_s15  ;;  %p961_p2 = scmp.lt.s32.totalorder %s959_s29, %s955_s15 }
  0x5e   : > { %748 = vmatpush.msrb.mxu3 %v1176_v13  ;;  %525 = vmatpush.msra.mxu2 %v500_v6  ;;  %v497_v13 = vld [vmem:[#allocation7 + $0x10] sm:$0xff] }
  0x5f   : > { %p957_p4 = pnand %p956_p1, %p1115_p3  ;;  %p962_p9 = por %p961_p2, %p960_p11 }
  0x60   : > { %749 = vmatpush.msrb.mxu3 %v1179_v15  ;;  %526 = vmatpush.msra.mxu2 %v499_v8  ;;  %v495_v15 = vld [vmem:[#allocation7] sm:$0xff] }
  0x61   : > { %371 = vmatmul.f32.gmra.mxu0 %v285_v38  ;;  %407 = vmatmul.f32.gmra.mxu3 %v309_v39  ;;  %p958_p8 = pneg %p957_p4 }
  0x62   : > { %750 = vmatpush.msrb.mxu3 %v1182_v17  ;;  %527 = vmatpush.msra.mxu2 %v498_v12 }
  0x63   : > { %436 = vmatmul.f32.gmra.mxu1 %v286_v40  ;;  %p963_p10 = pnand %p962_p9, %p958_p8 }
  0x64   : > { %751 = vmatpush.msrb.mxu3 %v335_v19  ;;  %528 = vmatpush.msra.mxu2 %v497_v13 }
  0x66   : > { %752 = vmatpush.msrb.mxu3 %v334_v21  ;;  %529 = vmatpush.msra.mxu2 %v496_v14 }
  0x68   : > { %753 = vmatpush.msrb.mxu3 %v333_v23  ;;  %530 = vmatpush.msra.mxu2 %v495_v15 }
  0x69   : > { %374 = vmatmul.f32.gmra.mxu0 %v287_v41  ;;  %410 = vmatmul.f32.gmra.mxu3 %v311_v42 }
  0x6a   : > { %754 = vmatpush.msrb.mxu3 %v332_v25 }
  0x6b   : > { %439 = vmatmul.f32.gmra.mxu1 %v288_v43 }
  0x6c   : > { %755 = vmatpush.msrb.mxu3 %v331_v27 }
  0x6e   : > { %756 = vmatpush.msrb.mxu3 %v330_v29 }
  0x70   : > { %757 = vmatpush.msrb.mxu3 %v329_v33 }
  0x71   : > { %377 = vmatmul.f32.gmra.mxu0 %v289_v44  ;;  %466 = vmatmul.f32.vlgmr.msrb.gmra.mxu3 %v306_v45 }
  0x72   : > { %758 = vmatpush.msra.mxu3 %v510_v56 }
  0x73   : > { %442 = vmatmul.f32.gmra.mxu1 %v290_v46 }
  0x74   : > { %759 = vmatpush.msra.mxu3 %v509_v57 }
  0x76   : > { %760 = vmatpush.msra.mxu3 %v508_v58 }
  0x78   : > { %761 = vmatpush.msra.mxu3 %v507_v60 }
  0x79   : > { %380 = vmatmul.f32.gmra.mxu0 %v291_v47  ;;  %469 = vmatmul.f32.gmra.mxu3 %v308_v48 }
  0x7a   : > { %762 = vmatpush.msra.mxu3 %v506_v62 }
  0x7b   : > { %445 = vmatmul.f32.gmra.mxu1 %v292_v49 }
  0x7c   : > { %763 = vmatpush.msra.mxu3 %v505_v63 }
  0x7e   : > { %764 = vmatpush.msra.mxu3 %v504_v0 }
  0x80   : > { %765 = vmatpush.msra.mxu3 %v503_v2 }
  0x81   : > { %383 = vmatmul.f32.gmra.mxu0 %v293_v50  ;;  %472 = vmatmul.f32.gmra.mxu3 %v310_v51 }
  0x82   : > { %766 = vmatpush.msra.mxu3 %v502_v4 }
  0x83   : > { %448 = vmatmul.f32.gmra.mxu1 %v294_v52 }
  0x84   : > { %767 = vmatpush.msra.mxu3 %v501_v5 }
  0x86   : > { %768 = vmatpush.msra.mxu3 %v500_v6 }
  0x88   : > { %769 = vmatpush.msra.mxu3 %v499_v8 }
  0x89   : > { %386 = vmatmul.f32.gmra.mxu0 %v295_v53  ;;  %475 = vmatmul.f32.gmra.mxu3 %v312_v54 }
  0x8a   : > { %770 = vmatpush.msra.mxu3 %v498_v12 }
  0x8b   : > { %451 = vmatmul.f32.gmra.mxu1 %v296_v55 }
  0x8c   : > { %771 = vmatpush.msra.mxu3 %v497_v13 }
  0x8e   : > { %772 = vmatpush.msra.mxu3 %v496_v14 }
  0x90   : > { %773 = vmatpush.msra.mxu3 %v495_v15 }
  0x91   : > { %389 = vmatmul.f32.gmra.mxu0 %v297_v59 }
  0x93   : > { %454 = vmatmul.f32.gmra.mxu1 %v298_v61 }
  0x99   : > { %392 = vmatmul.f32.gmra.mxu0 %v299_v1 }
  0x9b   : > { %457 = vmatmul.f32.gmra.mxu1 %v300_v3 }
  0xa1   : > { %395 = vmatmul.f32.gmra.mxu0 %v301_v7 }
  0xa3   : > { %460 = vmatmul.f32.gmra.mxu1 %v302_v9 }
  0xa9   : > { %398 = vmatmul.f32.gmra.mxu0 %v303_v10 }
  0xab   : > { %463 = vmatmul.f32.gmra.mxu1 %v304_v11 }
  0xce   : > { %v366_v17 = vpop.f32.mrf.mxu0 }
  0xcf   : > { %v367_v18 = vadd.f32 %v1230_v16, %v366_v17 }
  0xd0   : > { %v431_v19 = vpop.f32.mrf.mxu1 }
  0xd1   : > { %v432_v20 = vadd.f32 %v431_v19, %v367_v18 }
  0xd3   : > { %v479_v21 = vmax.f32 %v432_v20, 0.0 }
  0xd4   : > { %v402_v22 = vpop.f32.mrf.mxu3 }
  0xd5   : > { %531 = vmatmul.f32.vlgmr.msra.gmra.mxu2 %v479_v21  ;;  %v403_v45 = vadd.f32 %v1230_v16, %v402_v22 }
  0xd6   : > { %v369_v23 = vpop.f32.mrf.mxu0 }
  0xd7   : > { %v370_v24 = vadd.f32 %v1230_v16, %v369_v23 }
  0xd8   : > { %v434_v25 = vpop.f32.mrf.mxu1 }
  0xd9   : > { %v435_v26 = vadd.f32 %v434_v25, %v370_v24 }
  0xdb   : > { %v480_v27 = vmax.f32 %v435_v26, 0.0 }
  0xdc   : > { %v405_v28 = vpop.f32.mrf.mxu3 }
  0xdd   : > { %534 = vmatmul.f32.gmra.mxu2 %v480_v27  ;;  %v406_v54 = vadd.f32 %v1230_v16, %v405_v28 }
  0xde   : > { %v372_v29 = vpop.f32.mrf.mxu0 }
  0xdf   : > { %v373_v30 = vadd.f32 %v1230_v16, %v372_v29 }
  0xe0   : > { %v437_v31 = vpop.f32.mrf.mxu1 }
  0xe1   : > { %v438_v32 = vadd.f32 %v437_v31, %v373_v30 }
  0xe3   : > { %v481_v33 = vmax.f32 %v438_v32, 0.0 }
  0xe4   : > { %v408_v34 = vpop.f32.mrf.mxu3 }
  0xe5   : > { %537 = vmatmul.f32.gmra.mxu2 %v481_v33  ;;  %v409_v63 = vadd.f32 %v1230_v16, %v408_v34  ;;  %v848_v34 = vld [vmem:[%s1308_s4] ss:$0 sm:$0xff] }
  0xe6   : > { %v375_v35 = vpop.f32.mrf.mxu0 }
  0xe7   : > { %v376_v36 = vadd.f32 %v1230_v16, %v375_v35 }
  0xe8   : > { %v440_v37 = vpop.f32.mrf.mxu1 }
  0xe9   : > { %v441_v38 = vadd.f32 %v440_v37, %v376_v36 }
  0xeb   : > { %v482_v39 = vmax.f32 %v441_v38, 0.0 }
  0xec   : > { %v411_v40 = vpop.f32.mrf.mxu3 }
  0xed   : > { %540 = vmatmul.f32.gmra.mxu2 %v482_v39  ;;  %v412_v8 = vadd.f32 %v1230_v16, %v411_v40 }
  0xee   : > { %v378_v41 = vpop.f32.mrf.mxu0 }
  0xef   : > { %v379_v42 = vadd.f32 %v1230_v16, %v378_v41 }
  0xf0   : > { %v443_v43 = vpop.f32.mrf.mxu1 }
  0xf1   : > { %v444_v44 = vadd.f32 %v443_v43, %v379_v42 }
  0xf3   : > { %v483_v46 = vmax.f32 %v444_v44, 0.0 }
  0xf4   : > { %v467_v47 = vpop.f32.mrf.mxu3 }
  0xf5   : > { %v468_v48 = vadd.f32 %v467_v47, %v403_v45  ;;  %543 = vmatmul.f32.gmra.mxu2 %v483_v46 }
  0xf6   : > { %v381_v49 = vpop.f32.mrf.mxu0 }
  0xf7   : > { %v491_v50 = vmax.f32 %v468_v48, 0.0  ;;  %v382_v51 = vadd.f32 %v1230_v16, %v381_v49 }
  0xf8   : > { %v446_v52 = vpop.f32.mrf.mxu1 }
  0xf9   : > { %v447_v53 = vadd.f32 %v446_v52, %v382_v51  ;;  %567 = vmatmul.f32.vlgmr.msra.gmra.mxu3 %v491_v50 }
  0xfb   : > { %v484_v55 = vmax.f32 %v447_v53, 0.0 }
  0xfc   : > { %v470_v56 = vpop.f32.mrf.mxu3 }
  0xfd   : > { %v471_v57 = vadd.f32 %v470_v56, %v406_v54  ;;  %546 = vmatmul.f32.gmra.mxu2 %v484_v55 }
  0xfe   : > { %v384_v58 = vpop.f32.mrf.mxu0 }
  0xff   : > { %v492_v59 = vmax.f32 %v471_v57, 0.0  ;;  %v385_v60 = vadd.f32 %v1230_v16, %v384_v58 }
 0x100   : > { %v449_v61 = vpop.f32.mrf.mxu1 }
 0x101   : > { %v450_v62 = vadd.f32 %v449_v61, %v385_v60  ;;  %570 = vmatmul.f32.gmra.mxu3 %v492_v59 }
 0x103   : > { %v485_v0 = vmax.f32 %v450_v62, 0.0 }
 0x104   : > { %v473_v1 = vpop.f32.mrf.mxu3 }
 0x105   : > { %v474_v2 = vadd.f32 %v473_v1, %v409_v63  ;;  %549 = vmatmul.f32.gmra.mxu2 %v485_v0 }
 0x106   : > { %v387_v3 = vpop.f32.mrf.mxu0 }
 0x107   : > { %v493_v4 = vmax.f32 %v474_v2, 0.0  ;;  %v388_v5 = vadd.f32 %v1230_v16, %v387_v3 }
 0x108   : > { %v452_v6 = vpop.f32.mrf.mxu1 }
 0x109   : > { %v453_v7 = vadd.f32 %v452_v6, %v388_v5  ;;  %573 = vmatmul.f32.gmra.mxu3 %v493_v4 }
 0x10b   : > { %v486_v9 = vmax.f32 %v453_v7, 0.0 }
 0x10c   : > { %v476_v10 = vpop.f32.mrf.mxu3 }
 0x10d   : > { %v477_v11 = vadd.f32 %v476_v10, %v412_v8  ;;  %552 = vmatmul.f32.gmra.mxu2 %v486_v9 }
 0x10e   : > { %v390_v12 = vpop.f32.mrf.mxu0 }
 0x10f   : > { %v494_v13 = vmax.f32 %v477_v11, 0.0  ;;  %v391_v14 = vadd.f32 %v1230_v16, %v390_v12 }
 0x110   : > { %v455_v15 = vpop.f32.mrf.mxu1 }
 0x111   : > { %v456_v17 = vadd.f32 %v455_v15, %v391_v14  ;;  %576 = vmatmul.f32.gmra.mxu3 %v494_v13 }
 0x113   : > { %v487_v18 = vmax.f32 %v456_v17, 0.0 }
 0x115   : > { %555 = vmatmul.f32.gmra.mxu2 %v487_v18 }
 0x116   : > { %v393_v19 = vpop.f32.mrf.mxu0 }
 0x117   : > { %v394_v20 = vadd.f32 %v1230_v16, %v393_v19 }
 0x118   : > { %v458_v21 = vpop.f32.mrf.mxu1 }
 0x119   : > { %v459_v22 = vadd.f32 %v458_v21, %v394_v20 }
 0x11b   : > { %v488_v23 = vmax.f32 %v459_v22, 0.0 }
 0x11d   : > { %558 = vmatmul.f32.gmra.mxu2 %v488_v23 }
 0x11e   : > { %v396_v24 = vpop.f32.mrf.mxu0 }
 0x11f   : > { %v397_v25 = vadd.f32 %v1230_v16, %v396_v24 }
 0x120   : > { %v461_v26 = vpop.f32.mrf.mxu1 }
 0x121   : > { %v462_v27 = vadd.f32 %v461_v26, %v397_v25 }
 0x123   : > { %v489_v28 = vmax.f32 %v462_v27, 0.0 }
 0x125   : > { %561 = vmatmul.f32.gmra.mxu2 %v489_v28 }
 0x126   : > { %v399_v29 = vpop.f32.mrf.mxu0 }
 0x127   : > { %v400_v30 = vadd.f32 %v1230_v16, %v399_v29 }
 0x128   : > { %v464_v31 = vpop.f32.mrf.mxu1 }
 0x129   : > { %v465_v32 = vadd.f32 %v464_v31, %v400_v30 }
 0x12b   : > { %v490_v33 = vmax.f32 %v465_v32, 0.0 }
 0x12d   : > { %564 = vmatmul.f32.gmra.mxu2 %v490_v33 }
 0x158   : > { %v532_v35 = vpop.f32.mrf.mxu2 }
 0x159   : > { %v533_v36 = vadd.f32 %v848_v34, %v532_v35 }
 0x15b   : > { %580 = vst [vmem:[%s1252_s12] sm:$0xff] %v533_v36 }
 0x160   : > { %v535_v16 = vpop.f32.mrf.mxu2 }
 0x161   : > { %v536_v37 = vadd.f32 %v848_v34, %v535_v16 }
 0x163   : > { %581 = vst [vmem:[%s1252_s12 + $0x8] sm:$0xff] %v536_v37 }
 0x168   : > { %v538_v38 = vpop.f32.mrf.mxu2 }
 0x169   : > { %v539_v39 = vadd.f32 %v848_v34, %v538_v38 }
 0x16b   : > { %582 = vst [vmem:[%s1252_s12 + $0x10] sm:$0xff] %v539_v39 }
 0x170   : > { %v541_v40 = vpop.f32.mrf.mxu2 }
 0x171   : > { %v542_v41 = vadd.f32 %v848_v34, %v541_v40 }
 0x173   : > { %583 = vst [vmem:[%s1252_s12 + $0x18] sm:$0xff] %v542_v41 }
 0x178   : > { %v544_v42 = vpop.f32.mrf.mxu2 }
 0x179   : > { %v545_v43 = vadd.f32 %v848_v34, %v544_v42 }
 0x17b   : > { %584 = vst [vmem:[%s1252_s12 + $0x20] sm:$0xff] %v545_v43 }
 0x17c   : > { %v568_v44 = vpop.f32.mrf.mxu3 }
 0x17d   : > { %v569_v45 = vadd.f32 %v848_v34, %v568_v44 }
 0x17f   : > { %592 = vst [vmem:[%s1252_s12 + $0x60] sm:$0xff] %v569_v45 }
 0x180   : > { %v547_v46 = vpop.f32.mrf.mxu2 }
 0x181   : > { %v548_v47 = vadd.f32 %v848_v34, %v547_v46 }
 0x183   : > { %585 = vst [vmem:[%s1252_s12 + $0x28] sm:$0xff] %v548_v47 }
 0x184   : > { %v571_v48 = vpop.f32.mrf.mxu3 }
 0x185   : > { %v572_v49 = vadd.f32 %v848_v34, %v571_v48 }
 0x187   : > { %593 = vst [vmem:[%s1252_s12 + $0x68] sm:$0xff] %v572_v49 }
 0x188   : > { %v550_v50 = vpop.f32.mrf.mxu2 }
 0x189   : > { %v551_v51 = vadd.f32 %v848_v34, %v550_v50 }
 0x18b   : > { %586 = vst [vmem:[%s1252_s12 + $0x30] sm:$0xff] %v551_v51 }
 0x18c   : > { %v574_v52 = vpop.f32.mrf.mxu3 }
 0x18d   : > { %v575_v53 = vadd.f32 %v848_v34, %v574_v52 }
 0x18f   : > { %594 = vst [vmem:[%s1252_s12 + $0x70] sm:$0xff] %v575_v53 }
 0x190   : > { %v553_v54 = vpop.f32.mrf.mxu2 }
 0x191   : > { %v554_v55 = vadd.f32 %v848_v34, %v553_v54 }
 0x193   : > { %587 = vst [vmem:[%s1252_s12 + $0x38] sm:$0xff] %v554_v55 }
 0x194   : > { %v577_v56 = vpop.f32.mrf.mxu3 }
 0x195   : > { %v578_v57 = vadd.f32 %v848_v34, %v577_v56 }
 0x197   : > { %595 = vst [vmem:[%s1252_s12 + $0x78] sm:$0xff] %v578_v57 }
 0x198   : > { %v556_v58 = vpop.f32.mrf.mxu2 }
 0x199   : > { %v557_v59 = vadd.f32 %v848_v34, %v556_v58 }
 0x19b   : > { %588 = vst [vmem:[%s1252_s12 + $0x40] sm:$0xff] %v557_v59 }
 0x1a0   : > { %v559_v60 = vpop.f32.mrf.mxu2 }
 0x1a1   : > { %v560_v61 = vadd.f32 %v848_v34, %v559_v60 }
 0x1a3   : > { %589 = vst [vmem:[%s1252_s12 + $0x48] sm:$0xff] %v560_v61 }
 0x1a8   : > { %v562_v62 = vpop.f32.mrf.mxu2 }
 0x1a9   : > { %v563_v63 = vadd.f32 %v848_v34, %v562_v62 }
 0x1ab   : > { %590 = vst [vmem:[%s1252_s12 + $0x50] sm:$0xff] %v563_v63 }
 0x1b0   : > { %v565_v0 = vpop.f32.mrf.mxu2 }
 0x1b1   : > { %v566_v1 = vadd.f32 %v848_v34, %v565_v0 }
 0x1b3   : > { %591 = vst [vmem:[%s1252_s12 + $0x58] sm:$0xff] %v566_v1 }
 0x1b4   : > { %966 = shalt.err (!%p963_p10)
}
 0x1b5   : > { %s1017_s8 = smov 128   ;;  %s1018_s11 = smov 8  }
 0x1b6   : > { %784 = dma.vmem_to_hbm [thread:$0]  (%p1115_p3), %s610_s26, 2048, %s612_s7, %s597_s16, %s1017_s8, %s1017_s8, %s1018_s11  }
 0x1b7 PF: > { %s626_s12 = sand.u32 1, %s997_s18   ;;  %p1315_p12 = scmp.ge.s32.totalorder %s1009_s21, 2 }
 0x1b8   : > { %s627_s27 = scalar_lea.sflag [#allocation4], %s626_s12 }
 0x1b9   : > { %p798_p13 = pnand %p1315_p12, %p1084_p6 }
 0x1bb   : > { %p799_p0 = pneg %p798_p13 }
 0x1bd   : > { %992 = dma.done.wait (%p799_p0), %s627_s27, 2048  }
 0x1be   : > { %994 = vsyncadd (%p799_p0), %s627_s27, 4294965248  ;;  %p19_p5 = scmp.ge.s32.totalorder %s1105_s14, 4   ;;  %s1316_s18 = smov %s1001_s19 }
 0x1bf   : > { %s1317_s19 = smov %s1005_s20  ;;  %s1318_s20 = smov %s1121_s23 }
 0x1c0   : > { %s1319_s21 = smov %s1105_s14  ;;  %21 = sbr.rel (!%p19_p5) target bundleno = 6 (0x6), region = 93 }
 0x1c5   :  { %633 = vsyncpa [#allocation3], 1 }
 0x1c6   :  { %635 = vsyncpa [#allocation3 + $0x1], 1 }
 0x1c7   :  { %636 = vsyncpa [#allocation6], 1 }
 0x1c8   :  { %637 = vsyncpa [#allocation4], 1 }
 0x1c9   :  { %639 = vsyncpa [#allocation4 + $0x1], 1 }

</bundles_post_ra>
